<compile_context>
chip_gen: v6e
topology: v6e:2x2x1
jax: 0.10.0
libtpu: 0.0.40
codegen_flags: <defaults>
</compile_context>

<pallas_src>
import functools

import jax
import jax.numpy as jnp
from jax import lax
from jax.experimental import pallas as pl
from jax.experimental.pallas import tpu as pltpu


# --------------------------------------------------------------------------
# kernel
# --------------------------------------------------------------------------
def _ens_conv2d_kernel(x_ref, w_ref, b_ref, o_ref, *, Ho, Wo, Cin, Cout,
                       KH, KW, P):
    # x_ref: (nb, Hp, Wp*Cin)           padded NHWC rows (bf16/f32)
    # w_ref: (KH*KW, P*Cin, P*Cout)     per-tap block-diagonal packed weights
    # b_ref: (1, P*Cout)                bias tiled across P packed positions (f32)
    # o_ref: (nb, Ho, Wo*Cout)          conv output, lane-dense
    nb = o_ref.shape[0]
    bias = b_ref[...]                                   # (1, P*Cout) f32
    G = Wo // P                                         # column groups (1 at demo shape)
    for g in range(G):
        acc = jnp.zeros((nb * Ho, P * Cout), jnp.float32)
        for kh in range(KH):
            for kw in range(KW):
                t = kh * KW + kw
                c0 = (g * P + kw) * Cin
                # static slice of the padded image block: (nb, Ho, P*Cin)
                xs = x_ref[:, kh:kh + Ho, c0:c0 + P * Cin]
                xs = xs.reshape(nb * Ho, P * Cin)
                acc = acc + jnp.dot(xs, w_ref[t],
                                    preferred_element_type=jnp.float32)
        acc = acc + bias
        o_ref[:, :, g * P * Cout:(g + 1) * P * Cout] = (
            acc.reshape(nb, Ho, P * Cout).astype(o_ref.dtype))


# --------------------------------------------------------------------------
# trace-time sizing helpers
# --------------------------------------------------------------------------
def _tpu_vmem_and_cores():
    """Per-generation VMEM capacity + TensorCores per chip (best effort)."""
    vmem_cap = 64 * 1024 * 1024          # conservative fallback (v7x)
    num_cores = 1
    try:
        vmem_cap = int(pltpu.get_tpu_info().vmem_capacity_bytes)
    except Exception:
        pass
    try:
        kind = jax.devices()[0].device_kind.lower()
        if "v7" in kind:
            num_cores = 2                # v7x: 2 TensorCores per chip
    except Exception:
        pass
    return vmem_cap, num_cores


def _pick_pack(wo, cout, lane_target=128):
    """Largest divisor of Wo with P*Cout <= lane_target (>=1)."""
    pmax = max(1, lane_target // max(1, cout))
    best = 1
    for p in range(1, wo + 1):
        if wo % p == 0 and p <= pmax:
            best = p
    return best


def _pick_nb(n, per_img_bytes, budget_bytes, min_steps):
    """Largest divisor of n fitting the VMEM budget, keeping >= min_steps grid
    steps when possible.  Hard error if even one image does not fit."""
    if per_img_bytes > budget_bytes:
        raise ValueError(
            "EnsConv2d Pallas kernel: a single padded image's blocks "
            f"({per_img_bytes} B) exceed the VMEM budget ({budget_bytes} B); "
            "an Ho-tiling fallback is required for this shape.")
    best = 1
    for nb in range(1, n + 1):
        if n % nb:
            continue
        if nb * per_img_bytes > budget_bytes:
            continue
        if n // nb < min(min_steps, n):
            continue
        best = nb
    return best


# --------------------------------------------------------------------------
# weight preparation (hoisted out of the per-forward path)
# --------------------------------------------------------------------------
def prepare_ens_conv2d_weight(weight, *, out_width, compute_dtype=jnp.bfloat16,
                              lane_target=128):
    """Pack nn.Conv2d weight (Cout, Cin, KH, KW) into per-tap block-diagonal
    matrices (KH*KW, P*Cin, P*Cout) so the conv becomes lane-dense matmuls.
    Call once per weight update; pass the result to ens_conv2d_apply."""
    Cout, Cin, KH, KW = weight.shape
    P = _pick_pack(out_width, Cout, lane_target)
    w_taps = jnp.transpose(weight, (2, 3, 1, 0))        # (KH, KW, Cin, Cout)
    eye = jnp.eye(P, dtype=weight.dtype)
    blocks = [jnp.kron(eye, w_taps[i, j])               # (P*Cin, P*Cout)
              for i in range(KH) for j in range(KW)]
    return jnp.stack(blocks, axis=0).astype(compute_dtype)


# --------------------------------------------------------------------------
# forward
# --------------------------------------------------------------------------
@functools.partial(jax.jit, static_argnames=("kernel_hw", "padding"))
def ens_conv2d_apply(x, w_big, bias, *, kernel_hw=(3, 3), padding=1):
    """x: (B, E, C_in, H, W); w_big: prepared weight; bias: (C_out,).
    Implements stride=1 convolution (the module's default config)."""
    B, E, Cin, H, W = x.shape
    KH, KW = kernel_hw
    Cout = bias.shape[0]
    N = B * E
    Hp, Wp = H + 2 * padding, W + 2 * padding
    Ho, Wo = Hp - KH + 1, Wp - KW + 1                   # stride=1 output size
    P = w_big.shape[-1] // Cout                         # packed output positions
    assert w_big.shape == (KH * KW, P * Cin, P * Cout), "prepared weight mismatch"
    assert Wo % P == 0, "packing factor must divide the output width"

    compute_dtype = w_big.dtype

    # --- layout glue (single XLA pass): NCHW -> padded NHWC, cast to bf16 ---
    x_nhwc = jnp.transpose(x.reshape(N, Cin, H, W), (0, 2, 3, 1))
    x_pad = jnp.pad(
        x_nhwc, ((0, 0), (padding, padding), (padding, padding), (0, 0)))
    x_pad = x_pad.reshape(N, Hp, Wp * Cin).astype(compute_dtype)

    b_big = jnp.tile(bias.astype(jnp.float32), P).reshape(1, P * Cout)

    # --- per-chip block sizing -----------------------------------------------
    vmem_cap, num_cores = _tpu_vmem_and_cores()
    vmem_limit = min(64 * 1024 * 1024, vmem_cap // 2)   # 32 MiB on v7x, 64 MiB else
    in_itemsize = jnp.dtype(compute_dtype).itemsize
    out_itemsize = jnp.dtype(x.dtype).itemsize
    in_img = Hp * Wp * Cin * in_itemsize
    out_img = Ho * Wo * Cout * out_itemsize
    tap_img = Ho * P * Cin * in_itemsize
    # double-buffered in/out blocks + f32 accumulator + transient tap slices
    per_img = 2 * in_img + 2 * out_img + Ho * Wo * Cout * 4 + 2 * tap_img
    resident = (w_big.size * jnp.dtype(w_big.dtype).itemsize + b_big.size * 4)
    budget = vmem_limit - 2 * resident - (2 << 20)
    min_steps = 2 * num_cores if num_cores > 1 else 1   # keep both v7x TCs busy
    nb = _pick_nb(N, per_img, budget, min_steps)
    grid = (N // nb,)

    # --- cost estimate: FLOPs actually pushed to the MXU + true HBM bytes ----
    flops = 2 * N * Ho * (KH * KW * P * Cin) * (Wo * Cout)
    bytes_accessed = (x_pad.size * in_itemsize
                      + w_big.size * jnp.dtype(w_big.dtype).itemsize
                      + b_big.size * 4
                      + N * Ho * Wo * Cout * out_itemsize)

    kernel = functools.partial(_ens_conv2d_kernel, Ho=Ho, Wo=Wo, Cin=Cin,
                               Cout=Cout, KH=KH, KW=KW, P=P)

    out3 = pl.pallas_call(
        kernel,
        out_shape=jax.ShapeDtypeStruct((N, Ho, Wo * Cout), x.dtype),
        grid_spec=pltpu.PrefetchScalarGridSpec(
            num_scalar_prefetch=0,
            grid=grid,
            in_specs=[
                pl.BlockSpec((nb, Hp, Wp * Cin), lambda i: (i, 0, 0)),
                pl.BlockSpec((KH * KW, P * Cin, P * Cout), lambda i: (0, 0, 0)),
                pl.BlockSpec((1, P * Cout), lambda i: (0, 0)),
            ],
            out_specs=pl.BlockSpec((nb, Ho, Wo * Cout), lambda i: (i, 0, 0)),
        ),
        compiler_params=pltpu.CompilerParams(
            dimension_semantics=("parallel",),
            vmem_limit_bytes=vmem_limit,
        ),
        cost_estimate=pl.CostEstimate(
            flops=flops, transcendentals=0, bytes_accessed=bytes_accessed),
    )(x_pad, w_big, b_big)

    # --- back to PyTorch layout (B, E, C_out, Ho, Wo) -------------------------
    out = out3.reshape(N, Ho, Wo, Cout)
    out = jnp.transpose(out, (0, 3, 1, 2)).reshape(B, E, Cout, Ho, Wo)
    return out


def ens_conv2d(x, weight, bias, padding=1, compute_dtype=jnp.bfloat16):
    """Convenience wrapper (prep + apply).  Prefer hoisting prepare_* out of
    the per-forward path when weights are static."""
    KH, KW = weight.shape[-2:]
    Wo = x.shape[-1] + 2 * padding - KW + 1
    w_big = prepare_ens_conv2d_weight(weight, out_width=Wo,
                                      compute_dtype=compute_dtype)
    return ens_conv2d_apply(x, w_big, bias, kernel_hw=(KH, KW), padding=padding)


# --------------------------------------------------------------------------
# reference + demo
# --------------------------------------------------------------------------
def _reference(x, weight, bias, padding=1):
    B, E, Cin, H, W = x.shape
    Cout = weight.shape[0]
    x_m = x.reshape(B * E, Cin, H, W)
    out = lax.conv_general_dilated(
        x_m, weight, window_strides=(1, 1),
        padding=((padding, padding), (padding, padding)),
        dimension_numbers=("NCHW", "OIHW", "NCHW"),
    ) + bias.reshape(1, Cout, 1, 1)
    Ho, Wo = out.shape[-2:]
    return out.reshape(B, E, Cout, Ho, Wo)


if __name__ == "__main__":
    # Small shapes consistent with the module: ensemble-based 2D conv.
    B, E, Cin, H, W = 2, 3, 4, 16, 16
    Cout, KH, KW = 8, 3, 3
    padding = 1

    key = jax.random.PRNGKey(0)
    k_x, k_w, k_b = jax.random.split(key, 3)

    x = jax.random.normal(k_x, (B, E, Cin, H, W), dtype=jnp.float32)

    # Deterministic init matching torch.nn.Conv2d default (kaiming-uniform-ish):
    fan_in = Cin * KH * KW
    bound = fan_in ** -0.5
    weight = jax.random.uniform(
        k_w, (Cout, Cin, KH, KW), minval=-bound, maxval=bound, dtype=jnp.float32)
    bias = jax.random.uniform(
        k_b, (Cout,), minval=-bound, maxval=bound, dtype=jnp.float32)

    # Hoisted weight packing (once per weight update), then the fused forward.
    Wo = W + 2 * padding - KW + 1
    w_big = prepare_ens_conv2d_weight(weight, out_width=Wo,
                                      compute_dtype=jnp.bfloat16)
    out = ens_conv2d_apply(x, w_big, bias, kernel_hw=(KH, KW), padding=padding)
    out = jax.block_until_ready(out)

    ref = _reference(x, weight, bias, padding=padding)
    assert out.shape == ref.shape == (B, E, Cout, H, W)
    # bf16 matmul operands with f32 accumulation -> looser tolerance than f32.
    assert jnp.allclose(out, ref, atol=3e-2, rtol=3e-2), \
        "mismatch vs XLA conv reference"

    print("KERNEL_OK")
</pallas_src>

<mosaic_0001>
module attributes {stable_mosaic.version = 11 : i64} {
  func.func @_ens_conv2d_kernel(%arg0: i32, %arg1: memref<6x18x72xbf16, #tpu.memory_space<vmem>>, %arg2: memref<9x64x128xbf16, #tpu.memory_space<vmem>>, %arg3: memref<1x128xf32, #tpu.memory_space<vmem>>, %arg4: memref<6x16x128xf32, #tpu.memory_space<vmem>>) attributes {dimension_semantics = [#tpu.dimension_semantics<parallel>], iteration_bounds = array<i64: 1>, scalar_prefetch = 0 : i64, scratch_operands = 0 : i64, tpu.core_type = #tpu.core_type<tc>, window_params = [{transform_indices = @transform_0, window_bounds = array<i64: 6, 18, 72>}, {pipeline_mode = #tpu.pipeline_mode<synchronous>, transform_indices = @transform_1, window_bounds = array<i64: 9, 64, 128>}, {pipeline_mode = #tpu.pipeline_mode<synchronous>, transform_indices = @transform_2, window_bounds = array<i64: 1, 128>}, {transform_indices = @transform_3, window_bounds = array<i64: 6, 16, 128>}]} {
    %c0 = arith.constant 0 : index
    %c0_0 = arith.constant 0 : index
    %0 = vector.load %arg3[%c0, %c0_0] : memref<1x128xf32, #tpu.memory_space<vmem>>, vector<1x128xf32>
    %cst = arith.constant 0.000000e+00 : f32
    %1 = vector.broadcast %cst : f32 to vector<96x128xf32>
    %c0_1 = arith.constant 0 : index
    %c0_2 = arith.constant 0 : index
    %c0_3 = arith.constant 0 : index
    %2 = vector.load %arg1[%c0_1, %c0_2, %c0_3] : memref<6x18x72xbf16, #tpu.memory_space<vmem>>, vector<6x16x64xbf16>
    %3 = vector.shape_cast %2 : vector<6x16x64xbf16> to vector<96x64xbf16>
    %c0_4 = arith.constant 0 : index
    %c0_5 = arith.constant 0 : index
    %c0_6 = arith.constant 0 : index
    %4 = vector.load %arg2[%c0_4, %c0_5, %c0_6] : memref<9x64x128xbf16, #tpu.memory_space<vmem>>, vector<1x64x128xbf16>
    %5 = vector.shape_cast %4 : vector<1x64x128xbf16> to vector<64x128xbf16>
    %cst_7 = arith.constant dense<0.000000e+00> : vector<96x128xf32>
    %6 = tpu.matmul %3, %5, %cst_7 {dimension_numbers = #tpu.dot_dimension_numbers<[1], [0], [0], [1], [0, 0, 1, 1], [], []>} : vector<96x64xbf16>, vector<64x128xbf16>, vector<96x128xf32> -> vector<96x128xf32>
    %7 = arith.addf %1, %6 : vector<96x128xf32>
    %c0_8 = arith.constant 0 : index
    %c0_9 = arith.constant 0 : index
    %c4 = arith.constant 4 : index
    %8 = vector.load %arg1[%c0_8, %c0_9, %c4] : memref<6x18x72xbf16, #tpu.memory_space<vmem>>, vector<6x16x64xbf16>
    %9 = vector.shape_cast %8 : vector<6x16x64xbf16> to vector<96x64xbf16>
    %c1 = arith.constant 1 : index
    %c0_10 = arith.constant 0 : index
    %c0_11 = arith.constant 0 : index
    %10 = vector.load %arg2[%c1, %c0_10, %c0_11] : memref<9x64x128xbf16, #tpu.memory_space<vmem>>, vector<1x64x128xbf16>
    %11 = vector.shape_cast %10 : vector<1x64x128xbf16> to vector<64x128xbf16>
    %cst_12 = arith.constant dense<0.000000e+00> : vector<96x128xf32>
    %12 = tpu.matmul %9, %11, %cst_12 {dimension_numbers = #tpu.dot_dimension_numbers<[1], [0], [0], [1], [0, 0, 1, 1], [], []>} : vector<96x64xbf16>, vector<64x128xbf16>, vector<96x128xf32> -> vector<96x128xf32>
    %13 = arith.addf %7, %12 : vector<96x128xf32>
    %c0_13 = arith.constant 0 : index
    %c0_14 = arith.constant 0 : index
    %c8 = arith.constant 8 : index
    %14 = vector.load %arg1[%c0_13, %c0_14, %c8] : memref<6x18x72xbf16, #tpu.memory_space<vmem>>, vector<6x16x64xbf16>
    %15 = vector.shape_cast %14 : vector<6x16x64xbf16> to vector<96x64xbf16>
    %c2 = arith.constant 2 : index
    %c0_15 = arith.constant 0 : index
    %c0_16 = arith.constant 0 : index
    %16 = vector.load %arg2[%c2, %c0_15, %c0_16] : memref<9x64x128xbf16, #tpu.memory_space<vmem>>, vector<1x64x128xbf16>
    %17 = vector.shape_cast %16 : vector<1x64x128xbf16> to vector<64x128xbf16>
    %cst_17 = arith.constant dense<0.000000e+00> : vector<96x128xf32>
    %18 = tpu.matmul %15, %17, %cst_17 {dimension_numbers = #tpu.dot_dimension_numbers<[1], [0], [0], [1], [0, 0, 1, 1], [], []>} : vector<96x64xbf16>, vector<64x128xbf16>, vector<96x128xf32> -> vector<96x128xf32>
    %19 = arith.addf %13, %18 : vector<96x128xf32>
    %c0_18 = arith.constant 0 : index
    %c1_19 = arith.constant 1 : index
    %c0_20 = arith.constant 0 : index
    %20 = vector.load %arg1[%c0_18, %c1_19, %c0_20] : memref<6x18x72xbf16, #tpu.memory_space<vmem>>, vector<6x16x64xbf16>
    %21 = vector.shape_cast %20 : vector<6x16x64xbf16> to vector<96x64xbf16>
    %c3 = arith.constant 3 : index
    %c0_21 = arith.constant 0 : index
    %c0_22 = arith.constant 0 : index
    %22 = vector.load %arg2[%c3, %c0_21, %c0_22] : memref<9x64x128xbf16, #tpu.memory_space<vmem>>, vector<1x64x128xbf16>
    %23 = vector.shape_cast %22 : vector<1x64x128xbf16> to vector<64x128xbf16>
    %cst_23 = arith.constant dense<0.000000e+00> : vector<96x128xf32>
    %24 = tpu.matmul %21, %23, %cst_23 {dimension_numbers = #tpu.dot_dimension_numbers<[1], [0], [0], [1], [0, 0, 1, 1], [], []>} : vector<96x64xbf16>, vector<64x128xbf16>, vector<96x128xf32> -> vector<96x128xf32>
    %25 = arith.addf %19, %24 : vector<96x128xf32>
    %c0_24 = arith.constant 0 : index
    %c1_25 = arith.constant 1 : index
    %c4_26 = arith.constant 4 : index
    %26 = vector.load %arg1[%c0_24, %c1_25, %c4_26] : memref<6x18x72xbf16, #tpu.memory_space<vmem>>, vector<6x16x64xbf16>
    %27 = vector.shape_cast %26 : vector<6x16x64xbf16> to vector<96x64xbf16>
    %c4_27 = arith.constant 4 : index
    %c0_28 = arith.constant 0 : index
    %c0_29 = arith.constant 0 : index
    %28 = vector.load %arg2[%c4_27, %c0_28, %c0_29] : memref<9x64x128xbf16, #tpu.memory_space<vmem>>, vector<1x64x128xbf16>
    %29 = vector.shape_cast %28 : vector<1x64x128xbf16> to vector<64x128xbf16>
    %cst_30 = arith.constant dense<0.000000e+00> : vector<96x128xf32>
    %30 = tpu.matmul %27, %29, %cst_30 {dimension_numbers = #tpu.dot_dimension_numbers<[1], [0], [0], [1], [0, 0, 1, 1], [], []>} : vector<96x64xbf16>, vector<64x128xbf16>, vector<96x128xf32> -> vector<96x128xf32>
    %31 = arith.addf %25, %30 : vector<96x128xf32>
    %c0_31 = arith.constant 0 : index
    %c1_32 = arith.constant 1 : index
    %c8_33 = arith.constant 8 : index
    %32 = vector.load %arg1[%c0_31, %c1_32, %c8_33] : memref<6x18x72xbf16, #tpu.memory_space<vmem>>, vector<6x16x64xbf16>
    %33 = vector.shape_cast %32 : vector<6x16x64xbf16> to vector<96x64xbf16>
    %c5 = arith.constant 5 : index
    %c0_34 = arith.constant 0 : index
    %c0_35 = arith.constant 0 : index
    %34 = vector.load %arg2[%c5, %c0_34, %c0_35] : memref<9x64x128xbf16, #tpu.memory_space<vmem>>, vector<1x64x128xbf16>
    %35 = vector.shape_cast %34 : vector<1x64x128xbf16> to vector<64x128xbf16>
    %cst_36 = arith.constant dense<0.000000e+00> : vector<96x128xf32>
    %36 = tpu.matmul %33, %35, %cst_36 {dimension_numbers = #tpu.dot_dimension_numbers<[1], [0], [0], [1], [0, 0, 1, 1], [], []>} : vector<96x64xbf16>, vector<64x128xbf16>, vector<96x128xf32> -> vector<96x128xf32>
    %37 = arith.addf %31, %36 : vector<96x128xf32>
    %c0_37 = arith.constant 0 : index
    %c2_38 = arith.constant 2 : index
    %c0_39 = arith.constant 0 : index
    %38 = vector.load %arg1[%c0_37, %c2_38, %c0_39] : memref<6x18x72xbf16, #tpu.memory_space<vmem>>, vector<6x16x64xbf16>
    %39 = vector.shape_cast %38 : vector<6x16x64xbf16> to vector<96x64xbf16>
    %c6 = arith.constant 6 : index
    %c0_40 = arith.constant 0 : index
    %c0_41 = arith.constant 0 : index
    %40 = vector.load %arg2[%c6, %c0_40, %c0_41] : memref<9x64x128xbf16, #tpu.memory_space<vmem>>, vector<1x64x128xbf16>
    %41 = vector.shape_cast %40 : vector<1x64x128xbf16> to vector<64x128xbf16>
    %cst_42 = arith.constant dense<0.000000e+00> : vector<96x128xf32>
    %42 = tpu.matmul %39, %41, %cst_42 {dimension_numbers = #tpu.dot_dimension_numbers<[1], [0], [0], [1], [0, 0, 1, 1], [], []>} : vector<96x64xbf16>, vector<64x128xbf16>, vector<96x128xf32> -> vector<96x128xf32>
    %43 = arith.addf %37, %42 : vector<96x128xf32>
    %c0_43 = arith.constant 0 : index
    %c2_44 = arith.constant 2 : index
    %c4_45 = arith.constant 4 : index
    %44 = vector.load %arg1[%c0_43, %c2_44, %c4_45] : memref<6x18x72xbf16, #tpu.memory_space<vmem>>, vector<6x16x64xbf16>
    %45 = vector.shape_cast %44 : vector<6x16x64xbf16> to vector<96x64xbf16>
    %c7 = arith.constant 7 : index
    %c0_46 = arith.constant 0 : index
    %c0_47 = arith.constant 0 : index
    %46 = vector.load %arg2[%c7, %c0_46, %c0_47] : memref<9x64x128xbf16, #tpu.memory_space<vmem>>, vector<1x64x128xbf16>
    %47 = vector.shape_cast %46 : vector<1x64x128xbf16> to vector<64x128xbf16>
    %cst_48 = arith.constant dense<0.000000e+00> : vector<96x128xf32>
    %48 = tpu.matmul %45, %47, %cst_48 {dimension_numbers = #tpu.dot_dimension_numbers<[1], [0], [0], [1], [0, 0, 1, 1], [], []>} : vector<96x64xbf16>, vector<64x128xbf16>, vector<96x128xf32> -> vector<96x128xf32>
    %49 = arith.addf %43, %48 : vector<96x128xf32>
    %c0_49 = arith.constant 0 : index
    %c2_50 = arith.constant 2 : index
    %c8_51 = arith.constant 8 : index
    %50 = vector.load %arg1[%c0_49, %c2_50, %c8_51] : memref<6x18x72xbf16, #tpu.memory_space<vmem>>, vector<6x16x64xbf16>
    %51 = vector.shape_cast %50 : vector<6x16x64xbf16> to vector<96x64xbf16>
    %c8_52 = arith.constant 8 : index
    %c0_53 = arith.constant 0 : index
    %c0_54 = arith.constant 0 : index
    %52 = vector.load %arg2[%c8_52, %c0_53, %c0_54] : memref<9x64x128xbf16, #tpu.memory_space<vmem>>, vector<1x64x128xbf16>
    %53 = vector.shape_cast %52 : vector<1x64x128xbf16> to vector<64x128xbf16>
    %cst_55 = arith.constant dense<0.000000e+00> : vector<96x128xf32>
    %54 = tpu.matmul %51, %53, %cst_55 {dimension_numbers = #tpu.dot_dimension_numbers<[1], [0], [0], [1], [0, 0, 1, 1], [], []>} : vector<96x64xbf16>, vector<64x128xbf16>, vector<96x128xf32> -> vector<96x128xf32>
    %55 = arith.addf %49, %54 : vector<96x128xf32>
    %56 = vector.broadcast %0 : vector<1x128xf32> to vector<96x128xf32>
    %57 = arith.addf %55, %56 : vector<96x128xf32>
    %58 = vector.shape_cast %57 : vector<96x128xf32> to vector<6x16x128xf32>
    %c0_56 = arith.constant 0 : index
    %c0_57 = arith.constant 0 : index
    %c0_58 = arith.constant 0 : index
    %59 = vector.load %arg4[%c0_56, %c0_57, %c0_58] : memref<6x16x128xf32, #tpu.memory_space<vmem>>, vector<6x16x128xf32>
    tpu.vector_store %arg4[%c0_56, %c0_57, %c0_58], %58 {strides = array<i32>} : memref<6x16x128xf32, #tpu.memory_space<vmem>>, vector<6x16x128xf32>,
    return
  }
  func.func @transform_0(%arg0: i32) -> (i32, i32, i32) {
    %c0_i32 = arith.constant 0 : i32
    %c0_i32_0 = arith.constant 0 : i32
    %c0_i32_1 = arith.constant 0 : i32
    return %arg0, %c0_i32, %c0_i32_0 : i32, i32, i32
  }
  func.func @transform_1(%arg0: i32) -> (i32, i32, i32) {
    %c0_i32 = arith.constant 0 : i32
    %c0_i32_0 = arith.constant 0 : i32
    %c0_i32_1 = arith.constant 0 : i32
    %c0_i32_2 = arith.constant 0 : i32
    return %c0_i32, %c0_i32_0, %c0_i32_1 : i32, i32, i32
  }
  func.func @transform_2(%arg0: i32) -> (i32, i32) {
    %c0_i32 = arith.constant 0 : i32
    %c0_i32_0 = arith.constant 0 : i32
    %c0_i32_1 = arith.constant 0 : i32
    return %c0_i32, %c0_i32_0 : i32, i32
  }
  func.func @transform_3(%arg0: i32) -> (i32, i32, i32) {
    %c0_i32 = arith.constant 0 : i32
    %c0_i32_0 = arith.constant 0 : i32
    %c0_i32_1 = arith.constant 0 : i32
    return %arg0, %c0_i32, %c0_i32_0 : i32, i32, i32
  }
}

</mosaic_0001>

<bundles_post_ra>
// kernel: tile.9
= control target key start
LH: loop header
LB: loop body
LE: loop exit
PB: predicated region body
PF: predicated region fallthrough
CT: control target
= control target key end

     0   :  { %s133_s10 = smov 120   ;;  %s134_s11 = smov 104   ;;  %vm3_vm0 = vcmask 64512   ;;  %vm9_vm1 = vcmask 1048512   ;;  %vm15_vm2 = vcmask 982912   ;;  %vm21_vm3 = vcmask 917312   ;;  %s209_s0 = inlined_call_operand.vmem [shape: f32[16,8], index: 0, kind: input, shape index: {}]   ;;  %s210_s1 = inlined_call_operand.vmem [shape: f32[1,128], index: 1, kind: output, shape index: {}]  }
   0x1   :  { %v103_v0 = vld [vmem:[%s209_s0 + $0xf] sm:$0x1]   ;;  %v105_v1 = vld [vmem:[%s209_s0 + $0xd] sm:$0x1]   ;;  %v104_v2 = vld [vmem:[%s209_s0 + $0xe] sm:$0x1]  }
   0x2   :  { %7 = vrot.lane.b32.xlu0 %v103_v0, %s133_s10  ;;  %19 = vrot.lane.b32.xlu1 %v105_v1, %s134_s11  ;;  %v106_v3 = vld [vmem:[%s209_s0 + $0xc] sm:$0x1]   ;;  %s135_s16 = smov 112   ;;  %s136_s17 = smov 96   ;;  %v107_v4 = vld [vmem:[%s209_s0 + $0xb] sm:$0x1]  }
   0x3   :  { %v108_v5 = vld [vmem:[%s209_s0 + $0xa] sm:$0x1]   ;;  %v2_v6 = vld [vmem:[%s209_s0] sm:$0x1]   ;;  %s137_s24 = smov 88   ;;  %s138_s25 = smov 80  }
   0x4   :  { %4 = vst.msk [vmem:[#allocation0] sm:$0x1] %vm3_vm0, %v2_v6   ;;  %v109_v7 = vld [vmem:[%s209_s0 + $0x9] sm:$0x1]   ;;  %v110_v8 = vld [vmem:[%s209_s0 + $0x8] sm:$0x1]  }
   0x5   :  { %s139_s30 = smov 72   ;;  %s140_s2 = smov 64   ;;  %v111_v9 = vld [vmem:[%s209_s0 + $0x7] sm:$0x1]   ;;  %v112_v10 = vld [vmem:[%s209_s0 + $0x6] sm:$0x1]  }
   0x6   :  { %13 = vrot.lane.b32.xlu0 %v104_v2, %s135_s16  ;;  %25 = vrot.lane.b32.xlu1 %v106_v3, %s136_s17  ;;  %s141_s7 = smov 56   ;;  %s142_s8 = smov 48   ;;  %v113_v11 = vld [vmem:[%s209_s0 + $0x5] sm:$0x1]   ;;  %v114_v12 = vld [vmem:[%s209_s0 + $0x4] sm:$0x1]  }
   0x7   :  { %s143_s13 = smov 40   ;;  %s144_s14 = smov 32   ;;  %v115_v13 = vld [vmem:[%s209_s0 + $0x3] sm:$0x1]   ;;  %v116_v14 = vld [vmem:[%s209_s0 + $0x2] sm:$0x1]  }
   0x8   :  { %s145_s19 = smov 24   ;;  %s146_s20 = smov 16   ;;  %v117_v15 = vld [vmem:[%s209_s0 + $0x1] sm:$0x1]   ;;  %vm27_vm4 = vcmask 851712   ;;  %vm33_vm5 = vcmask 786112  }
   0x9   :  { %s147_s0 = smov 8   ;;  %vm39_vm6 = vcmask 720512   ;;  %vm45_vm7 = vcmask 654912   ;;  %vm51_vm8 = vcmask 589312   ;;  %vm57_vm9 = vcmask 523712  }
   0xa   :  { %31 = vrot.lane.b32.xlu0 %v107_v4, %s137_s24  ;;  %37 = vrot.lane.b32.xlu1 %v108_v5, %s138_s25  ;;  %vm63_vm10 = vcmask 458112   ;;  %vm69_vm11 = vcmask 392512   ;;  %vm75_vm12 = vcmask 326912   ;;  %vm81_vm13 = vcmask 261312  }
   0xb   :  { %vm87_vm14 = vcmask 195712   ;;  %vm93_vm15 = vcmask 130112  }
   0xe   :  { %43 = vrot.lane.b32.xlu0 %v109_v7, %s139_s30  ;;  %49 = vrot.lane.b32.xlu1 %v110_v8, %s140_s2 }
  0x12   :  { %55 = vrot.lane.b32.xlu0 %v111_v9, %s141_s7  ;;  %61 = vrot.lane.b32.xlu1 %v112_v10, %s142_s8 }
  0x16   :  { %67 = vrot.lane.b32.xlu0 %v113_v11, %s143_s13  ;;  %73 = vrot.lane.b32.xlu1 %v114_v12, %s144_s14 }
  0x1a   :  { %79 = vrot.lane.b32.xlu0 %v115_v13, %s145_s19  ;;  %85 = vrot.lane.b32.xlu1 %v116_v14, %s146_s20 }
  0x1e   :  { %91 = vrot.lane.b32.xlu0 %v117_v15, %s147_s0 }
  0x74   :  { %v8_v16 = vpop.permute.xlu0 %7   ;;  %v20_v17 = vpop.permute.xlu1 %19  }
  0x75   :  { %10 = vst.msk [vmem:[#allocation0] sm:$0x1] %vm9_vm1, %v8_v16  }
  0x78   :  { %v14_v18 = vpop.permute.xlu0 %13   ;;  %v26_v19 = vpop.permute.xlu1 %25  }
  0x79   :  { %16 = vst.msk [vmem:[#allocation0] sm:$0x1] %vm15_vm2, %v14_v18  }
  0x7a   :  { %22 = vst.msk [vmem:[#allocation0] sm:$0x1] %vm21_vm3, %v20_v17  }
  0x7b   :  { %28 = vst.msk [vmem:[#allocation0] sm:$0x1] %vm27_vm4, %v26_v19  }
  0x7c   :  { %v32_v20 = vpop.permute.xlu0 %31   ;;  %v38_v21 = vpop.permute.xlu1 %37  }
  0x7d   :  { %34 = vst.msk [vmem:[#allocation0] sm:$0x1] %vm33_vm5, %v32_v20  }
  0x7e   :  { %40 = vst.msk [vmem:[#allocation0] sm:$0x1] %vm39_vm6, %v38_v21  }
  0x80   :  { %v44_v22 = vpop.permute.xlu0 %43   ;;  %v50_v23 = vpop.permute.xlu1 %49  }
  0x81   :  { %46 = vst.msk [vmem:[#allocation0] sm:$0x1] %vm45_vm7, %v44_v22  }
  0x82   :  { %52 = vst.msk [vmem:[#allocation0] sm:$0x1] %vm51_vm8, %v50_v23  }
  0x84   :  { %v56_v24 = vpop.permute.xlu0 %55   ;;  %v62_v25 = vpop.permute.xlu1 %61  }
  0x85   :  { %58 = vst.msk [vmem:[#allocation0] sm:$0x1] %vm57_vm9, %v56_v24  }
  0x86   :  { %64 = vst.msk [vmem:[#allocation0] sm:$0x1] %vm63_vm10, %v62_v25  }
  0x88   :  { %v68_v26 = vpop.permute.xlu0 %67   ;;  %v74_v27 = vpop.permute.xlu1 %73  }
  0x89   :  { %70 = vst.msk [vmem:[#allocation0] sm:$0x1] %vm69_vm11, %v68_v26  }
  0x8a   :  { %76 = vst.msk [vmem:[#allocation0] sm:$0x1] %vm75_vm12, %v74_v27  }
  0x8c   :  { %v80_v28 = vpop.permute.xlu0 %79   ;;  %v86_v29 = vpop.permute.xlu1 %85  }
  0x8d   :  { %82 = vst.msk [vmem:[#allocation0] sm:$0x1] %vm81_vm13, %v80_v28  }
  0x8e   :  { %88 = vst.msk [vmem:[#allocation0] sm:$0x1] %vm87_vm14, %v86_v29  }
  0x90   :  { %v92_v30 = vpop.permute.xlu0 %91  }
  0x91   :  { %94 = vst.msk [vmem:[#allocation0] sm:$0x1] %vm93_vm15, %v92_v30  }
  0x98   :  { %v99_v31 = vld [vmem:[#allocation0] sm:$0x1] }
  0x99   :  { %102 = vst [vmem:[%s210_s1] sm:$0x1] %v99_v31 }

// kernel: tile.8
= control target key start
LH: loop header
LB: loop body
LE: loop exit
PB: predicated region body
PF: predicated region fallthrough
CT: control target
= control target key end

     0   :  { %s28_s0 = inlined_call_operand.vmem [shape: f32[8], index: 0, kind: input, shape index: {}]   ;;  %s29_s1 = inlined_call_operand.vmem [shape: f32[16,8], index: 1, kind: output, shape index: {}]  }
   0x1   :  { %v4_v0 = vld [vmem:[%s28_s0] ss:$0 sm:$0xff] }
   0x2   :  { %5 = vst [vmem:[%s29_s1] sm:$0xff] %v4_v0  ;;  %8 = vst [vmem:[%s29_s1 + $0x8] sm:$0xff] %v4_v0 }

// kernel: ens_conv2d_apply.1
= control target key start
LH: loop header
LB: loop body
LE: loop exit
PB: predicated region body
PF: predicated region fallthrough
CT: control target
= control target key end

     0   :  { %vm508_vm0 = vsmask.f32 3328  ;;  %vm509_vm1 = vsmask.f32 7440  ;;  %s2207_s16 = smov 124   ;;  %s2208_s17 = smov 120   ;;  %s2993_s0 = inlined_call_operand.vmem [shape: bf16[6,18,72], index: 0, kind: input, shape index: {}]   ;;  %s2994_s1 = inlined_call_operand.vmem [shape: bf16[9,64,128], index: 1, kind: input, shape index: {}]   ;;  %s2995_s2 = inlined_call_operand.vmem [shape: f32[1,128], index: 2, kind: input, shape index: {}]   ;;  %s2996_s3 = inlined_call_operand.vmem [shape: f32[6,16,128], index: 3, kind: output, shape index: {}]  }
   0x1   :  { %v2232_v0 = vld [vmem:[%s2993_s0 + $0x30] sm:$0xff]   ;;  %v2237_v1 = vld [vmem:[%s2993_s0 + $0x3c] sm:$0xff]   ;;  %v2261_v5 = vld [vmem:[%s2993_s0 + $0x24] sm:$0xff]   ;;  %vm1153_vm3 = vcmask 1042432   ;;  %vm1154_vm4 = vcmask 1046532   ;;  %vm111_vm6 = vcmask 523264  }
   0x2   :  { %83 = vrot.lane.b32.xlu0 %v2232_v0, %s2207_s16  ;;  %v2244_v2 = vld [vmem:[%s2993_s0] sm:$0xff]   ;;  %85 = vrot.lane.b32.xlu1 %v2237_v1, %s2207_s16  ;;  %v2251_v3 = vld [vmem:[%s2993_s0 + $0xc] sm:$0xff]   ;;  %vm2313_vm2 = vmor %vm508_vm0, %vm509_vm1 }
   0x3   :  { %v2256_v4 = vld [vmem:[%s2993_s0 + $0x18] sm:$0xff]   ;;  %v490_v6 = vld [vmem:[%s2993_s0] sm:$0xf]  ;;  %v2271_v7 = vld [vmem:[%s2993_s0 + $0x4] sm:$0xf] }
   0x4   :  { %v2276_v8 = vld [vmem:[%s2993_s0 + $0x8] sm:$0x1]  ;;  %v512_v9 = vshrl.u32 %v490_v6, 16  ;;  %v515_v10 = vshll.u32 %v490_v6, 16  ;;  %v521_v11 = vshll.u32 %v2271_v7, 16  ;;  %v525_v12 = vshrl.u32 %v2271_v7, 16  ;;  %vm2467_vm5 = vmor %vm1153_vm3, %vm1154_vm4 }
   0x5   :  { %v493_v13 = vld [vmem:[%s2993_s0 + $0xc] sm:$0xf]  ;;  %v531_v14 = vshll.u32 %v2276_v8, 16  ;;  %v2289_v15 = vld [vmem:[%s2993_s0 + $0x10] sm:$0xf]  ;;  %v2171_v47 = vld [vmem:[%s2994_s1 + $0x38] sm:$0xff]  }
   0x6   :  { %75 = vrot.lane.b32.xlu0 %v2244_v2, %s2207_s16  ;;  %77 = vrot.lane.b32.xlu1 %v2251_v3, %s2207_s16  ;;  %v2294_v16 = vld [vmem:[%s2993_s0 + $0x14] sm:$0x1]  ;;  %v536_v17 = vshrl.u32 %v493_v13, 16  ;;  %v514_v18 = vrot.slane %v512_v9, 4  ;;  %v517_v19 = vrot.slane %v515_v10, 5  ;;  %v523_v20 = vrot.slane %v521_v11, 5 }
   0x7   :  { %v527_v21 = vrot.slane %v525_v12, 4  ;;  %v496_v22 = vld [vmem:[%s2993_s0 + $0x18] sm:$0xf]  ;;  %v533_v23 = vrot.slane %v531_v14, 5  ;;  %v539_v25 = vshll.u32 %v493_v13, 16  ;;  %v545_v26 = vshll.u32 %v2289_v15, 16  ;;  %2155 = vmatprep.subr.bf16.mxu1 %v2171_v47  ;;  %1975 = vmatprep.subr.bf16.mxu0 %v2171_v47 }
   0x8   :  { %v538_v24 = vrot.slane %v536_v17, 4  ;;  %v518_v27 = vor.u32 %v517_v19, %v514_v18  ;;  %v549_v29 = vshrl.u32 %v2289_v15, 16  ;;  %v555_v30 = vshll.u32 %v2294_v16, 16  ;;  %v2309_v31 = vld [vmem:[%s2993_s0 + $0x1c] sm:$0xf]  ;;  %v2172_v53 = vld [vmem:[%s2994_s1 + $0x30] sm:$0xff]   ;;  %2159 = vmatpush3.bf16.msra.mxu1 %v2171_v47  ;;  %1976 = vmatpush3.bf16.msra.mxu0 %v2171_v47 }
   0x9   :  { %v528_v28 = vor.u32 %v527_v21, %v523_v20  ;;  %v541_v33 = vrot.slane %v539_v25, 5  ;;  %v547_v34 = vrot.slane %v545_v26, 5  ;;  %v560_v35 = vshrl.u32 %v496_v22, 16  ;;  %v2320_v41 = vld [vmem:[%s2993_s0 + $0x20] sm:$0x1]  ;;  %2156 = vmatprep.subr.bf16.mxu1 %v2172_v53  ;;  %v2173_v12 = vld [vmem:[%s2994_s1 + $0x28] sm:$0xff]   ;;  %1977 = vmatprep.subr.bf16.mxu0 %v2172_v53 }
   0xa   :  { %79 = vrot.lane.b32.xlu0 %v2256_v4, %s2207_s16  ;;  %81 = vrot.lane.b32.xlu1 %v2261_v5, %s2207_s16  ;;  %v563_v36 = vshll.u32 %v496_v22, 16  ;;  %v519_v37 = vrot.slane %v518_v27, 4  ;;  %v551_v39 = vrot.slane %v549_v29, 4  ;;  %v557_v40 = vrot.slane %v555_v30, 5  ;;  %v499_v46 = vld [vmem:[%s2993_s0 + $0x24] sm:$0xf] }
   0xb   :  { %v529_v38 = vrot.slane %v528_v28, 4  ;;  %v542_v42 = vor.u32 %v541_v33, %v538_v24  ;;  %v562_v43 = vrot.slane %v560_v35, 4  ;;  %v569_v45 = vshll.u32 %v2309_v31, 16  ;;  %v2341_v52 = vld [vmem:[%s2993_s0 + $0x28] sm:$0xf] }
   0xc   :  { %v565_v44 = vrot.slane %v563_v36, 5  ;;  %v524_v48 = vsel %vm2313_vm2, %v519_v37, %v523_v20  ;;  %v552_v50 = vor.u32 %v551_v39, %v547_v34  ;;  %v573_v51 = vshrl.u32 %v2309_v31, 16  ;;  %v2352_v61 = vld [vmem:[%s2993_s0 + $0x2c] sm:$0x1]  ;;  %v502_v11 = vld [vmem:[%s2993_s0 + $0x30] sm:$0xf]  ;;  %2160 = vmatpush3.bf16.msra.mxu1 %v2172_v53  ;;  %1978 = vmatpush3.bf16.msra.mxu0 %v2172_v53 }
   0xd   :  { %v534_v49 = vsel %vm2313_vm2, %v529_v38, %v533_v23  ;;  %v543_v55 = vrot.slane %v542_v42, 4  ;;  %v571_v57 = vrot.slane %v569_v45, 5  ;;  %v579_v60 = vshll.u32 %v2320_v41, 16  ;;  %v2372_v19 = vld [vmem:[%s2993_s0 + $0x34] sm:$0xf]  ;;  %2157 = vmatprep.subr.bf16.mxu1 %v2173_v12  ;;  %v2174_v37 = vld [vmem:[%s2994_s1 + $0x20] sm:$0xff]   ;;  %1979 = vmatprep.subr.bf16.mxu0 %v2173_v12 }
   0xe   :  { %343 = vrot.lane.b32.xlu0 %v2244_v2, %s2208_s17  ;;  %345 = vrot.lane.b32.xlu1 %v2251_v3, %s2208_s17  ;;  %v2346_v54 = vcombine.low %v524_v48, %v534_v49  ;;  %v566_v56 = vor.u32 %v565_v44, %v562_v43  ;;  %v553_v58 = vrot.slane %v552_v50, 4  ;;  %v575_v59 = vrot.slane %v573_v51, 4  ;;  %v2381_v24 = vld [vmem:[%s2993_s0 + $0x38] sm:$0x1]  ;;  %v505_v25 = vld [vmem:[%s2993_s0 + $0x3c] sm:$0xf] }
   0xf   :  { %v584_v62 = vshrl.u32 %v499_v46, 16  ;;  %v548_v63 = vsel %vm2313_vm2, %v543_v55, %v547_v34  ;;  %v587_v9 = vshll.u32 %v499_v46, 16  ;;  %v593_v10 = vshll.u32 %v2341_v52, 16  ;;  %v2391_v30 = vld [vmem:[%s2993_s0 + $0x40] sm:$0xf]  ;;  %v2415_v53 = vld [vmem:[%s2994_s1 + $0x18] sm:$0xff]  }
  0x10   :  { %v567_v6 = vrot.slane %v566_v56, 4  ;;  %v558_v13 = vsel %vm2313_vm2, %v553_v58, %v557_v40  ;;  %v576_v14 = vor.u32 %v575_v59, %v571_v57  ;;  %v581_v17 = vrot.slane %v579_v60, 5  ;;  %v2410_v50 = vld [vmem:[%s2993_s0 + $0x44] sm:$0x1]  ;;  %2161 = vmatpush3.bf16.msra.mxu1 %v2173_v12  ;;  %1980 = vmatpush3.bf16.msra.mxu0 %v2173_v12  ;;  %v2181_v32 = vld [vmem:[%s2994_s1 + $0x48] sm:$0xff]  }
  0x11   :  { %v586_v18 = vrot.slane %v584_v62, 4  ;;  %v2374_v20 = vcombine.low %v548_v63, %v558_v13  ;;  %v589_v22 = vrot.slane %v587_v9, 5  ;;  %v595_v23 = vrot.slane %v593_v10, 5  ;;  %2158 = vmatprep.subr.bf16.mxu1 %v2174_v37  ;;  %1981 = vmatprep.subr.bf16.mxu0 %v2174_v37 }
  0x12   :  { %347 = vrot.lane.b32.xlu0 %v2256_v4, %s2208_s17  ;;  %349 = vrot.lane.b32.xlu1 %v2261_v5, %s2208_s17  ;;  %v572_v21 = vsel %vm2313_vm2, %v567_v6, %v571_v57  ;;  %v577_v26 = vrot.slane %v576_v14, 4  ;;  %v597_v27 = vshrl.u32 %v2341_v52, 16  ;;  %v603_v28 = vshll.u32 %v2352_v61, 16  ;;  %v2427_v6 = vld [vmem:[%s2994_s1 + $0x58] sm:$0xff]  }
  0x13   :  { %v608_v29 = vshrl.u32 %v502_v11, 16  ;;  %v590_v33 = vor.u32 %v589_v22, %v586_v18  ;;  %v611_v34 = vshll.u32 %v502_v11, 16  ;;  %v617_v35 = vshll.u32 %v2372_v19, 16 }
  0x14   :  { %v621_v36 = vshrl.u32 %v2372_v19, 16  ;;  %v582_v38 = vsel %vm2313_vm2, %v577_v26, %v581_v17  ;;  %v599_v39 = vrot.slane %v597_v27, 4  ;;  %v605_v40 = vrot.slane %v603_v28, 5  ;;  %2162 = vmatpush3.bf16.msra.mxu1 %v2174_v37  ;;  %1982 = vmatpush3.bf16.msra.mxu0 %v2174_v37 }
  0x15   :  { %v610_v42 = vrot.slane %v608_v29, 4  ;;  %v2404_v43 = vcombine.low %v572_v21, %v582_v38  ;;  %v591_v44 = vrot.slane %v590_v33, 4  ;;  %v613_v45 = vrot.slane %v611_v34, 5  ;;  %1995 = vmatprep.subr.bf16.mxu1 %v2415_v53  ;;  %2015 = vmatprep.subr.bf16.mxu0 %v2427_v6 }
  0x16   :  { %351 = vrot.lane.b32.xlu0 %v2232_v0, %s2208_s17  ;;  %353 = vrot.lane.b32.xlu1 %v2237_v1, %s2208_s17  ;;  %v619_v46 = vrot.slane %v617_v35, 5  ;;  %v600_v47 = vor.u32 %v599_v39, %v595_v23  ;;  %v623_v48 = vrot.slane %v621_v36, 4  ;;  %v627_v49 = vshll.u32 %v2381_v24, 16  ;;  %v1129_v35 = vld [vmem:[%s2993_s0] sm:$0xe] }
  0x17   :  { %v632_v51 = vshrl.u32 %v505_v25, 16  ;;  %v596_v55 = vsel %vm2313_vm2, %v591_v44, %v595_v23  ;;  %v614_v56 = vor.u32 %v613_v45, %v610_v42  ;;  %v635_v57 = vshll.u32 %v505_v25, 16  ;;  %v1130_v39 = vld [vmem:[%s2993_s0 + $0xc] sm:$0xe]  ;;  %v1131_v45 = vld [vmem:[%s2993_s0 + $0x18] sm:$0xe] }
  0x18   :  { %v641_v58 = vshll.u32 %v2391_v30, 16  ;;  %v601_v59 = vrot.slane %v600_v47, 4  ;;  %v624_v60 = vor.u32 %v623_v48, %v619_v46  ;;  %v629_v62 = vrot.slane %v627_v49, 5 }
  0x19   :  { %v634_v63 = vrot.slane %v632_v51, 4  ;;  %v615_v9 = vrot.slane %v614_v56, 4  ;;  %v637_v10 = vrot.slane %v635_v57, 5  ;;  %v645_v12 = vshrl.u32 %v2391_v30, 16 }
  0x1a   :  { %826 = vrot.lane.b32.xlu0 %v2346_v54, %s2207_s16  ;;  %828 = vrot.lane.b32.xlu1 %v2374_v20, %s2207_s16  ;;  %v643_v11 = vrot.slane %v641_v58, 5  ;;  %v606_v13 = vsel %vm2313_vm2, %v601_v59, %v605_v40  ;;  %v625_v14 = vrot.slane %v624_v60, 4  ;;  %v651_v17 = vshll.u32 %v2410_v50, 16 }
  0x1b   :  { %v2435_v18 = vcombine.low %v596_v55, %v606_v13  ;;  %v620_v21 = vsel %vm2313_vm2, %v615_v9, %v619_v46  ;;  %v638_v22 = vor.u32 %v637_v10, %v634_v63  ;;  %v647_v23 = vrot.slane %v645_v12, 4  ;;  %v1134_v10 = vld [vmem:[%s2993_s0 + $0x3c] sm:$0xe] }
  0x1c   :  { %v630_v25 = vsel %vm2313_vm2, %v625_v14, %v629_v62  ;;  %v653_v29 = vrot.slane %v651_v17, 5  ;;  %v1158_v36 = vrot.slane %v2271_v7, 5  ;;  %v1818_v40 = vrot.slane %v1129_v35, 9  ;;  %v1133_v62 = vld [vmem:[%s2993_s0 + $0x30] sm:$0xe] }
  0x1d   :  { %v2445_v26 = vcombine.low %v620_v21, %v630_v25  ;;  %v639_v27 = vrot.slane %v638_v22, 4  ;;  %v648_v28 = vor.u32 %v647_v23, %v643_v11  ;;  %v1161_v7 = vrot.slane %v2276_v8, 5 }
  0x1e   :  { %830 = vrot.lane.b32.xlu0 %v2404_v43, %s2207_s16  ;;  %832 = vrot.lane.b32.xlu1 %v2435_v18, %s2207_s16  ;;  %v1160_v42 = vrot.slane %v1158_v36, 4  ;;  %v1165_v44 = vrot.slane %v2289_v15, 5  ;;  %v1819_v46 = vrot.slane %v1130_v39, 9  ;;  %v1172_v47 = vrot.slane %v2309_v31, 5  ;;  %v1132_v31 = vld [vmem:[%s2993_s0 + $0x24] sm:$0xe] }
  0x1f   :  { %v644_v33 = vsel %vm2313_vm2, %v639_v27, %v643_v11  ;;  %v649_v34 = vrot.slane %v648_v28, 4  ;;  %v1159_v8 = vsel %vm2467_vm5, %v1818_v40, %v1158_v36  ;;  %v1168_v49 = vrot.slane %v2294_v16, 5  ;;  %v2176_v36 = vld [vmem:[%s2994_s1 + $0x10] sm:$0xff]   ;;  %v2178_v40 = vld [vmem:[%s2994_s1 + $0x8] sm:$0xff]  }
  0x20   :  { %v1162_v48 = vsel %vm2467_vm5, %v1160_v42, %v1161_v7  ;;  %v1167_v15 = vrot.slane %v1165_v44, 4  ;;  %v1820_v55 = vrot.slane %v1131_v45, 9  ;;  %v1174_v56 = vrot.slane %v1172_v47, 4  ;;  %v2179_v42 = vld [vmem:[%s2994_s1 + $0x50] sm:$0xff]   ;;  %v2183_v45 = vld [vmem:[%s2994_s1 + $0x78] sm:$0xff]  }
  0x21   :  { %v654_v37 = vsel %vm2313_vm2, %v649_v34, %v653_v29  ;;  %v2487_v51 = vcombine.low %v1159_v8, %v1162_v48  ;;  %v1175_v57 = vrot.slane %v2320_v41, 5  ;;  %v1166_v58 = vsel %vm2467_vm5, %v1819_v46, %v1165_v44  ;;  %v2185_v8 = vld [vmem:[%s2994_s1 + $0x70] sm:$0xff]  }
  0x22   :  { %834 = vrot.lane.b32.xlu0 %v2445_v26, %s2207_s16  ;;  %v2457_v38 = vcombine.low %v644_v33, %v654_v37  ;;  %v1169_v16 = vsel %vm2467_vm5, %v1167_v15, %v1168_v49  ;;  %v1179_v59 = vrot.slane %v2341_v52, 5  ;;  %v1173_v60 = vsel %vm2467_vm5, %v1820_v55, %v1172_v47  ;;  %v2184_v47 = vld [vmem:[%s2994_s1 + $0x98] sm:$0xff]   ;;  %v2186_v15 = vld [vmem:[%s2994_s1 + $0x90] sm:$0xff]   ;;  %v2187_v55 = vld [vmem:[%s2994_s1 + $0x68] sm:$0xff]  }
  0x23   :  { %v2509_v41 = vcombine.low %v1166_v58, %v1169_v16  ;;  %v1176_v63 = vsel %vm2467_vm5, %v1174_v56, %v1175_v57  ;;  %v1821_v9 = vrot.slane %v1132_v31, 9  ;;  %v1186_v52 = vrot.slane %v2372_v19, 5  ;;  %v2190_v57 = vld [vmem:[%s2994_s1 + $0x80] sm:$0xff]   ;;  %v2191_v58 = vld [vmem:[%s2994_s1 + $0xb8] sm:$0xff]  }
  0x24   :  { %836 = vrot.lane.b32.xlu1 %v2457_v38, %s2207_s16  ;;  %v1181_v11 = vrot.slane %v1179_v59, 4  ;;  %v1182_v12 = vrot.slane %v2352_v61, 5  ;;  %v1193_v13 = vrot.slane %v2391_v30, 5  ;;  %v2521_v14 = vcombine.low %v1173_v60, %v1176_v63 }
  0x25   :  { %v1822_v17 = vrot.slane %v1133_v62, 9  ;;  %v1188_v21 = vrot.slane %v1186_v52, 4  ;;  %v1189_v19 = vrot.slane %v2381_v24, 5  ;;  %v1180_v22 = vsel %vm2467_vm5, %v1821_v9, %v1179_v59  ;;  %v2193_v59 = vld [vmem:[%s2994_s1 + $0xb0] sm:$0xff]   ;;  %v2195_v62 = vld [vmem:[%s2994_s1 + $0xa8] sm:$0xff]  }
  0x26   :  { %982 = vrot.lane.b32.xlu0 %v2346_v54, %s2208_s17  ;;  %v1183_v61 = vsel %vm2467_vm5, %v1181_v11, %v1182_v12  ;;  %v1823_v23 = vrot.slane %v1134_v10, 9  ;;  %v1195_v30 = vrot.slane %v1193_v13, 4  ;;  %v1196_v25 = vrot.slane %v2410_v50, 5  ;;  %v2199_v10 = vld [vmem:[%s2994_s1 + $0xf8] sm:$0xff]  }
  0x27   :  { %v2535_v27 = vcombine.low %v1180_v22, %v1183_v61  ;;  %v1187_v24 = vsel %vm2467_vm5, %v1822_v17, %v1186_v52  ;;  %v1190_v28 = vsel %vm2467_vm5, %v1188_v21, %v1189_v19  ;;  %v2198_v52 = vld [vmem:[%s2994_s1 + $0xc0] sm:$0xff]   ;;  %v2201_v17 = vld [vmem:[%s2994_s1 + $0xf0] sm:$0xff]   ;;  %v2204_v61 = vld [vmem:[%s2994_s1 + $0x108] sm:$0xff]  }
  0x28   :  { %984 = vrot.lane.b32.xlu1 %v2374_v20, %s2208_s17  ;;  %v2543_v29 = vcombine.low %v1187_v24, %v1190_v28  ;;  %v1194_v50 = vsel %vm2467_vm5, %v1823_v23, %v1193_v13  ;;  %v1197_v33 = vsel %vm2467_vm5, %v1195_v30, %v1196_v25  ;;  %v2205_v30 = vld [vmem:[%s2994_s1 + $0xe0] sm:$0xff]  }
  0x29   :  { %v2555_v34 = vcombine.low %v1194_v50, %v1197_v33 }
  0x2a   :  { %986 = vrot.lane.b32.xlu0 %v2404_v43, %s2208_s17 }
  0x2c   :  { %988 = vrot.lane.b32.xlu1 %v2435_v18, %s2208_s17 }
  0x2e   :  { %990 = vrot.lane.b32.xlu0 %v2445_v26, %s2208_s17 }
  0x30   :  { %992 = vrot.lane.b32.xlu1 %v2457_v38, %s2208_s17 }
  0x32   :  { %1369 = vrot.lane.b32.xlu0 %v2487_v51, %s2207_s16 }
  0x34   :  { %1371 = vrot.lane.b32.xlu1 %v2509_v41, %s2207_s16 }
  0x36   :  { %1525 = vrot.lane.b32.xlu0 %v2487_v51, %s2208_s17 }
  0x38   :  { %1527 = vrot.lane.b32.xlu1 %v2509_v41, %s2208_s17 }
  0x3a   :  { %1373 = vrot.lane.b32.xlu0 %v2521_v14, %s2207_s16 }
  0x3c   :  { %1375 = vrot.lane.b32.xlu1 %v2535_v27, %s2207_s16 }
  0x3e   :  { %1529 = vrot.lane.b32.xlu0 %v2521_v14, %s2208_s17 }
  0x40   :  { %1531 = vrot.lane.b32.xlu1 %v2535_v27, %s2208_s17 }
  0x42   :  { %1377 = vrot.lane.b32.xlu0 %v2543_v29, %s2207_s16 }
  0x44   :  { %1379 = vrot.lane.b32.xlu1 %v2555_v34, %s2207_s16 }
  0x46   :  { %1533 = vrot.lane.b32.xlu0 %v2543_v29, %s2208_s17 }
  0x48   :  { %1535 = vrot.lane.b32.xlu1 %v2555_v34, %s2208_s17 }
  0x74   :  { %v84_v35 = vpop.permute.xlu0 %83  ;;  %v86_v37 = vpop.permute.xlu1 %85 }
  0x75   :  { %1991 = vmatprep.mubr.msk.bf16.mxu1 %vm111_vm6, %v84_v35 }
  0x76   :  { %1992 = vmatmul.mubr.msk.bf16.vlgmr.msra.gmra.mxu1 %vm111_vm6, %v86_v37 }
  0x77   :  { %1996 = vmatpush3.bf16.msra.mxu1 %v2415_v53  ;;  %2003 = vmatprep.mubr.msk.bf16.mxu1 %vm111_vm6, %v2244_v2  ;;  %v2180_v53 = vld [vmem:[%s2994_s1] sm:$0xff]  }
  0x78   :  { %v76_v39 = vpop.permute.xlu0 %75  ;;  %1997 = vmatprep.subr.bf16.mxu1 %v2176_v36  ;;  %v78_v7 = vpop.permute.xlu1 %77 }
  0x79   :  { %1983 = vmatprep.mubr.msk.bf16.mxu0 %vm111_vm6, %v76_v39 }
  0x7a   :  { %1984 = vmatmul.mubr.msk.bf16.vlgmr.msra.gmra.mxu0 %vm111_vm6, %v78_v7 }
  0x7b   :  { %1998 = vmatpush3.bf16.msra.mxu1 %v2176_v36  ;;  %2016 = vmatpush3.bf16.msra.mxu0 %v2427_v6  ;;  %v2182_v6 = vld [vmem:[%s2994_s1 + $0x40] sm:$0xff]  }
  0x7c   :  { %1999 = vmatprep.subr.bf16.mxu1 %v2178_v40  ;;  %2017 = vmatprep.subr.bf16.mxu0 %v2179_v42  ;;  %v80_v2 = vpop.permute.xlu0 %79  ;;  %v82_v44 = vpop.permute.xlu1 %81 }
  0x7d   :  { %1987 = vmatprep.mubr.msk.bf16.mxu0 %vm111_vm6, %v80_v2 }
  0x7f   :  { %2000 = vmatpush3.bf16.msra.mxu1 %v2178_v40  ;;  %2018 = vmatpush3.bf16.msra.mxu0 %v2179_v42 }
  0x80   :  { %2001 = vmatprep.subr.bf16.mxu1 %v2180_v53  ;;  %2019 = vmatprep.subr.bf16.mxu0 %v2181_v32  ;;  %v344_v46 = vpop.permute.xlu0 %343  ;;  %v346_v48 = vpop.permute.xlu1 %345 }
  0x82   :  { %1988 = vmatmul.mubr.msk.bf16.gmra.mxu0 %vm111_vm6, %v82_v44 }
  0x83   :  { %2002 = vmatpush3.bf16.msra.mxu1 %v2180_v53  ;;  %2020 = vmatpush3.bf16.msra.mxu0 %v2181_v32 }
  0x84   :  { %2021 = vmatprep.subr.bf16.mxu0 %v2182_v6  ;;  %2035 = vmatprep.subr.bf16.mxu1 %v2183_v45  ;;  %v348_v49 = vpop.permute.xlu0 %347  ;;  %v350_v31 = vpop.permute.xlu1 %349 }
  0x85   :  { %2023 = vmatprep.mubr.msk.bf16.mxu0 %vm111_vm6, %v344_v46 }
  0x86   :  { %2004 = vmatmul.mubr.msk.bf16.vlgmr.msra.gmra.mxu1 %vm111_vm6, %v2251_v3  ;;  %v2188_v3 = vld [vmem:[%s2994_s1 + $0x88] sm:$0xff]  }
  0x87   :  { %2022 = vmatpush3.bf16.msra.mxu0 %v2182_v6  ;;  %2036 = vmatpush3.bf16.msra.mxu1 %v2183_v45 }
  0x88   :  { %2055 = vmatprep.subr.bf16.mxu0 %v2184_v47  ;;  %2007 = vmatprep.mubr.msk.bf16.mxu1 %vm111_vm6, %v2256_v4  ;;  %v2189_v4 = vld [vmem:[%s2994_s1 + $0x60] sm:$0xff]   ;;  %v352_v56 = vpop.permute.xlu0 %351 }
  0x89   :  { %2037 = vmatprep.subr.bf16.mxu1 %v2185_v8 }
  0x8a   :  { %2024 = vmatmul.mubr.msk.bf16.vlgmr.msra.gmra.mxu0 %vm111_vm6, %v346_v48 }
  0x8b   :  { %2056 = vmatpush3.bf16.msra.mxu0 %v2184_v47  ;;  %2038 = vmatpush3.bf16.msra.mxu1 %v2185_v8 }
  0x8c   :  { %2057 = vmatprep.subr.bf16.mxu0 %v2186_v15  ;;  %2027 = vmatprep.mubr.msk.bf16.mxu0 %vm111_vm6, %v348_v49  ;;  %v827_v16 = vpop.permute.xlu0 %826 }
  0x8d   :  { %2039 = vmatprep.subr.bf16.mxu1 %v2187_v55 }
  0x8e   :  { %2008 = vmatmul.mubr.msk.bf16.gmra.mxu1 %vm111_vm6, %v2261_v5  ;;  %v354_v5 = vpop.permute.xlu1 %353 }
  0x8f   :  { %2058 = vmatpush3.bf16.msra.mxu0 %v2186_v15  ;;  %2011 = vmatprep.mubr.msk.bf16.mxu1 %vm111_vm6, %v2232_v0  ;;  %v2192_v0 = vld [vmem:[%s2994_s1 + $0xd8] sm:$0xff]  }
  0x90   :  { %2040 = vmatpush3.bf16.msra.mxu1 %v2187_v55  ;;  %2059 = vmatprep.subr.bf16.mxu0 %v2188_v3  ;;  %v831_v60 = vpop.permute.xlu0 %830 }
  0x91   :  { %2041 = vmatprep.subr.bf16.mxu1 %v2189_v4 }
  0x92   :  { %2028 = vmatmul.mubr.msk.bf16.gmra.mxu0 %vm111_vm6, %v350_v31 }
  0x93   :  { %2060 = vmatpush3.bf16.msra.mxu0 %v2188_v3  ;;  %2031 = vmatprep.mubr.msk.bf16.mxu0 %vm111_vm6, %v352_v56 }
  0x94   :  { %2042 = vmatpush3.bf16.msra.mxu1 %v2189_v4  ;;  %2061 = vmatprep.subr.bf16.mxu0 %v2190_v57  ;;  %v835_v63 = vpop.permute.xlu0 %834 }
  0x95   :  { %2075 = vmatprep.subr.bf16.mxu1 %v2191_v58 }
  0x96   :  { %2012 = vmatmul.mubr.msk.bf16.gmra.mxu1 %vm111_vm6, %v2237_v1  ;;  %v829_v1 = vpop.permute.xlu1 %828 }
  0x97   :  { %2043 = vmatprep.mubr.msk.bf16.mxu1 %vm111_vm6, %v2346_v54  ;;  %2062 = vmatpush3.bf16.msra.mxu0 %v2190_v57  ;;  %v2194_v54 = vld [vmem:[%s2994_s1 + $0xd0] sm:$0xff]  }
  0x98   :  { %2095 = vmatprep.subr.bf16.mxu0 %v2192_v0 }
  0x9a   :  { %2032 = vmatmul.mubr.msk.bf16.gmra.mxu0 %vm111_vm6, %v354_v5  ;;  %v833_v9 = vpop.permute.xlu1 %832 }
  0x9b   :  { %2063 = vmatprep.mubr.msk.bf16.mxu0 %vm111_vm6, %v827_v16 }
  0x9e   :  { %2044 = vmatmul.mubr.msk.bf16.vlgmr.msra.gmra.mxu1 %vm111_vm6, %v2374_v20  ;;  %v2196_v20 = vld [vmem:[%s2994_s1 + $0xc8] sm:$0xff]   ;;  %v837_v11 = vpop.permute.xlu1 %836 }
  0x9f   :  { %2076 = vmatpush3.bf16.msra.mxu1 %v2191_v58  ;;  %2047 = vmatprep.mubr.msk.bf16.mxu1 %vm111_vm6, %v2404_v43  ;;  %v2197_v43 = vld [vmem:[%s2994_s1 + $0xa0] sm:$0xff]  }
  0xa0   :  { %2077 = vmatprep.subr.bf16.mxu1 %v2193_v59 }
  0xa2   :  { %2064 = vmatmul.mubr.msk.bf16.vlgmr.msra.gmra.mxu0 %vm111_vm6, %v829_v1  ;;  %v985_v13 = vpop.permute.xlu1 %984 }
  0xa3   :  { %2096 = vmatpush3.bf16.msra.mxu0 %v2192_v0  ;;  %2078 = vmatpush3.bf16.msra.mxu1 %v2193_v59 }
  0xa4   :  { %2097 = vmatprep.subr.bf16.mxu0 %v2194_v54  ;;  %2067 = vmatprep.mubr.msk.bf16.mxu0 %vm111_vm6, %v831_v60 }
  0xa5   :  { %2079 = vmatprep.subr.bf16.mxu1 %v2195_v62 }
  0xa6   :  { %2048 = vmatmul.mubr.msk.bf16.gmra.mxu1 %vm111_vm6, %v2435_v18  ;;  %v983_v18 = vpop.permute.xlu0 %982  ;;  %v989_v19 = vpop.permute.xlu1 %988 }
  0xa7   :  { %2098 = vmatpush3.bf16.msra.mxu0 %v2194_v54  ;;  %2051 = vmatprep.mubr.msk.bf16.mxu1 %vm111_vm6, %v2445_v26  ;;  %v2200_v26 = vld [vmem:[%s2994_s1 + $0x118] sm:$0xff]  }
  0xa8   :  { %2080 = vmatpush3.bf16.msra.mxu1 %v2195_v62  ;;  %2099 = vmatprep.subr.bf16.mxu0 %v2196_v20 }
  0xa9   :  { %2081 = vmatprep.subr.bf16.mxu1 %v2197_v43 }
  0xaa   :  { %2068 = vmatmul.mubr.msk.bf16.gmra.mxu0 %vm111_vm6, %v833_v9  ;;  %v987_v12 = vpop.permute.xlu0 %986  ;;  %v993_v23 = vpop.permute.xlu1 %992 }
  0xab   :  { %2100 = vmatpush3.bf16.msra.mxu0 %v2196_v20  ;;  %2071 = vmatprep.mubr.msk.bf16.mxu0 %vm111_vm6, %v835_v63 }
  0xac   :  { %2082 = vmatpush3.bf16.msra.mxu1 %v2197_v43  ;;  %2101 = vmatprep.subr.bf16.mxu0 %v2198_v52 }
  0xad   :  { %2115 = vmatprep.subr.bf16.mxu1 %v2199_v10 }
  0xae   :  { %2052 = vmatmul.mubr.msk.bf16.gmra.mxu1 %vm111_vm6, %v2457_v38  ;;  %v991_v21 = vpop.permute.xlu0 %990  ;;  %v2202_v38 = vld [vmem:[%s2994_s1 + $0x110] sm:$0xff]   ;;  %v1372_v25 = vpop.permute.xlu1 %1371 }
  0xaf   :  { %2083 = vmatprep.mubr.msk.bf16.mxu1 %vm111_vm6, %v983_v18  ;;  %2102 = vmatpush3.bf16.msra.mxu0 %v2198_v52 }
  0xb0   :  { %2135 = vmatprep.subr.bf16.mxu0 %v2200_v26 }
  0xb2   :  { %2072 = vmatmul.mubr.msk.bf16.gmra.mxu0 %vm111_vm6, %v837_v11  ;;  %v1370_v22 = vpop.permute.xlu0 %1369  ;;  %v1528_v28 = vpop.permute.xlu1 %1527 }
  0xb3   :  { %2103 = vmatprep.mubr.msk.bf16.mxu0 %vm111_vm6, %v2487_v51  ;;  %v2203_v51 = vld [vmem:[%s2994_s1 + $0xe8] sm:$0xff]  }
  0xb6   :  { %2084 = vmatmul.mubr.msk.bf16.vlgmr.msra.gmra.mxu1 %vm111_vm6, %v985_v13 }
  0xb7   :  { %2116 = vmatpush3.bf16.msra.mxu1 %v2199_v10  ;;  %2087 = vmatprep.mubr.msk.bf16.mxu1 %vm111_vm6, %v987_v12 }
  0xb8   :  { %2117 = vmatprep.subr.bf16.mxu1 %v2201_v17 }
  0xba   :  { %2104 = vmatmul.mubr.msk.bf16.vlgmr.msra.gmra.mxu0 %vm111_vm6, %v2509_v41  ;;  %v2206_v41 = vld [vmem:[%s2994_s1 + $0x100] sm:$0xff]  }
  0xbb   :  { %2136 = vmatpush3.bf16.msra.mxu0 %v2200_v26  ;;  %2118 = vmatpush3.bf16.msra.mxu1 %v2201_v17 }
  0xbc   :  { %2137 = vmatprep.subr.bf16.mxu0 %v2202_v38  ;;  %2107 = vmatprep.mubr.msk.bf16.mxu0 %vm111_vm6, %v2521_v14  ;;  %v1526_v14 = vpop.permute.xlu0 %1525 }
  0xbd   :  { %2119 = vmatprep.subr.bf16.mxu1 %v2203_v51 }
  0xbe   :  { %2088 = vmatmul.mubr.msk.bf16.gmra.mxu1 %vm111_vm6, %v989_v19 }
  0xbf   :  { %2138 = vmatpush3.bf16.msra.mxu0 %v2202_v38  ;;  %2091 = vmatprep.mubr.msk.bf16.mxu1 %vm111_vm6, %v991_v21 }
  0xc0   :  { %2120 = vmatpush3.bf16.msra.mxu1 %v2203_v51  ;;  %2139 = vmatprep.subr.bf16.mxu0 %v2204_v61  ;;  %v1374_v24 = vpop.permute.xlu0 %1373 }
  0xc1   :  { %2121 = vmatprep.subr.bf16.mxu1 %v2205_v30 }
  0xc2   :  { %2108 = vmatmul.mubr.msk.bf16.gmra.mxu0 %vm111_vm6, %v2535_v27  ;;  %v1376_v27 = vpop.permute.xlu1 %1375 }
  0xc3   :  { %2140 = vmatpush3.bf16.msra.mxu0 %v2204_v61  ;;  %2111 = vmatprep.mubr.msk.bf16.mxu0 %vm111_vm6, %v2543_v29 }
  0xc4   :  { %2122 = vmatpush3.bf16.msra.mxu1 %v2205_v30  ;;  %2141 = vmatprep.subr.bf16.mxu0 %v2206_v41  ;;  %v1530_v50 = vpop.permute.xlu0 %1529 }
  0xc6   :  { %2092 = vmatmul.mubr.msk.bf16.gmra.mxu1 %vm111_vm6, %v993_v23  ;;  %v1532_v33 = vpop.permute.xlu1 %1531 }
  0xc7   :  { %2123 = vmatprep.mubr.msk.bf16.mxu1 %vm111_vm6, %v1370_v22  ;;  %2142 = vmatpush3.bf16.msra.mxu0 %v2206_v41 }
  0xc8   :  { %v1378_v29 = vpop.permute.xlu0 %1377 }
  0xca   :  { %2112 = vmatmul.mubr.msk.bf16.gmra.mxu0 %vm111_vm6, %v2555_v34  ;;  %v1380_v34 = vpop.permute.xlu1 %1379 }
  0xcb   :  { %2143 = vmatprep.mubr.msk.bf16.mxu0 %vm111_vm6, %v1526_v14 }
  0xcc   :  { %v1534_v35 = vpop.permute.xlu0 %1533 }
  0xce   :  { %2124 = vmatmul.mubr.msk.bf16.vlgmr.msra.gmra.mxu1 %vm111_vm6, %v1372_v25  ;;  %v1536_v36 = vpop.permute.xlu1 %1535 }
  0xcf   :  { %2127 = vmatprep.mubr.msk.bf16.mxu1 %vm111_vm6, %v1374_v24 }
  0xd2   :  { %2144 = vmatmul.mubr.msk.bf16.vlgmr.msra.gmra.mxu0 %vm111_vm6, %v1528_v28 }
  0xd3   :  { %2147 = vmatprep.mubr.msk.bf16.mxu0 %vm111_vm6, %v1530_v50 }
  0xd6   :  { %2128 = vmatmul.mubr.msk.bf16.gmra.mxu1 %vm111_vm6, %v1376_v27 }
  0xd7   :  { %2131 = vmatprep.mubr.msk.bf16.mxu1 %vm111_vm6, %v1378_v29 }
  0xda   :  { %2148 = vmatmul.mubr.msk.bf16.gmra.mxu0 %vm111_vm6, %v1532_v33 }
  0xdb   :  { %2151 = vmatprep.mubr.msk.bf16.mxu0 %vm111_vm6, %v1534_v35 }
  0xde   :  { %2132 = vmatmul.mubr.msk.bf16.gmra.mxu1 %vm111_vm6, %v1380_v34 }
  0xe2   :  { %2152 = vmatmul.mubr.msk.bf16.gmra.mxu0 %vm111_vm6, %v1536_v36 }
 0x136   :  { %v2727_v37 = vpop.f32.mrf.mxu1 }
 0x138   :  { %v2731_v40 = vpop.f32.mrf.mxu1 }
 0x13a   :  { %v2729_v39 = vpop.f32.mrf.mxu0  ;;  %v2737_v2 = vpop.f32.mrf.mxu1 }
 0x13c   :  { %v2733_v42 = vpop.f32.mrf.mxu0  ;;  %v2743_v44 = vpop.f32.mrf.mxu1 }
 0x13e   :  { %v2735_v7 = vpop.f32.mrf.mxu0 }
 0x140   :  { %v2739_v53 = vpop.f32.mrf.mxu0 }
 0x142   :  { %v2741_v32 = vpop.f32.mrf.mxu0 }
 0x144   :  { %v2745_v6 = vpop.f32.mrf.mxu0 }
 0x146   :  { %v2747_v45 = vpop.f32.mrf.mxu1  ;;  %v2749_v46 = vpop.f32.mrf.mxu0 }
 0x148   :  { %v2751_v47 = vpop.f32.mrf.mxu1  ;;  %v2753_v8 = vpop.f32.mrf.mxu0 }
 0x14a   :  { %v2755_v48 = vpop.f32.mrf.mxu1  ;;  %v2757_v15 = vpop.f32.mrf.mxu0 }
 0x14c   :  { %v2759_v49 = vpop.f32.mrf.mxu1  ;;  %v2761_v55 = vpop.f32.mrf.mxu0 }
 0x14e   :  { %v2763_v3 = vpop.f32.mrf.mxu1  ;;  %v2765_v4 = vpop.f32.mrf.mxu0 }
 0x150   :  { %v2767_v31 = vpop.f32.mrf.mxu1  ;;  %v2769_v56 = vpop.f32.mrf.mxu0 }
 0x152   :  { %v2771_v57 = vpop.f32.mrf.mxu1  ;;  %v2773_v58 = vpop.f32.mrf.mxu0 }
 0x154   :  { %v2775_v0 = vpop.f32.mrf.mxu1  ;;  %v2777_v5 = vpop.f32.mrf.mxu0 }
 0x156   :  { %v2779_v16 = vpop.f32.mrf.mxu1  ;;  %v2781_v59 = vpop.f32.mrf.mxu0 }
 0x158   :  { %v2783_v1 = vpop.f32.mrf.mxu1  ;;  %v2785_v54 = vpop.f32.mrf.mxu0 }
 0x15a   :  { %v2787_v60 = vpop.f32.mrf.mxu1  ;;  %v2789_v62 = vpop.f32.mrf.mxu0 }
 0x15c   :  { %v2791_v20 = vpop.f32.mrf.mxu1  ;;  %v2793_v43 = vpop.f32.mrf.mxu0 }
 0x15d   :  { %3001 = vst [vmem:[#allocation2_spill] sm:$0xff] %v2791_v20  ;;  %3002 = vst [vmem:[#allocation3_spill] sm:$0xff] %v2793_v43 }
 0x15e   :  { %v2045_v63 = vpop.f32.mrf.mxu1  ;;  %v2795_v9 = vpop.f32.mrf.mxu0 }
 0x15f   :  { %3003 = vst [vmem:[#allocation4_spill] sm:$0xff] %v2795_v9 }
 0x160   :  { %v758_v52 = vpop.f32.mrf.mxu1  ;;  %v2797_v10 = vpop.f32.mrf.mxu0 }
 0x161   :  { %3004 = vst [vmem:[#allocation5_spill] sm:$0xff] %v2797_v10 }
 0x162   :  { %v2046_v18 = vpop.f32.mrf.mxu1  ;;  %v2065_v26 = vpop.f32.mrf.mxu0 }
 0x164   :  { %v2799_v11 = vpop.f32.mrf.mxu1  ;;  %v914_v12 = vpop.f32.mrf.mxu0 }
 0x166   :  { %v2801_v13 = vpop.f32.mrf.mxu1  ;;  %v2066_v17 = vpop.f32.mrf.mxu0 }
 0x168   :  { %v2803_v21 = vpop.f32.mrf.mxu1  ;;  %v2805_v38 = vpop.f32.mrf.mxu0 }
 0x16a   :  { %v2807_v19 = vpop.f32.mrf.mxu1  ;;  %v2809_v51 = vpop.f32.mrf.mxu0 }
 0x16c   :  { %v2811_v22 = vpop.f32.mrf.mxu1  ;;  %v2813_v61 = vpop.f32.mrf.mxu0 }
 0x16d   :  { %3005 = vst [vmem:[#allocation6_spill] sm:$0xff] %v2811_v22 }
 0x16e   :  { %v2815_v23 = vpop.f32.mrf.mxu1  ;;  %v2817_v30 = vpop.f32.mrf.mxu0 }
 0x16f   :  { %3006 = vst [vmem:[#allocation7_spill] sm:$0xff] %v2815_v23  ;;  %3007 = vst [vmem:[#allocation8_spill] sm:$0xff] %v2817_v30 }
 0x170   :  { %v2819_v41 = vpop.f32.mrf.mxu1  ;;  %v2821_v14 = vpop.f32.mrf.mxu0 }
 0x171   :  { %3008 = vst [vmem:[#allocation9_spill] sm:$0xff] %v2819_v41  ;;  %3009 = vst [vmem:[#allocation10_spill] sm:$0xff] %v2821_v14 }
 0x172   :  { %v2823_v25 = vpop.f32.mrf.mxu1  ;;  %v2825_v24 = vpop.f32.mrf.mxu0 }
 0x173   :  { %3010 = vst [vmem:[#allocation11_spill] sm:$0xff] %v2823_v25  ;;  %3011 = vst [vmem:[#allocation12_spill] sm:$0xff] %v2825_v24 }
 0x174   :  { %v2827_v28 = vpop.f32.mrf.mxu1  ;;  %v2829_v50 = vpop.f32.mrf.mxu0 }
 0x175   :  { %3012 = vst [vmem:[#allocation13_spill] sm:$0xff] %v2827_v28  ;;  %3013 = vst [vmem:[#allocation14_spill] sm:$0xff] %v2829_v50 }
 0x176   :  { %v2085_v27 = vpop.f32.mrf.mxu1  ;;  %v2831_v29 = vpop.f32.mrf.mxu0 }
 0x177   :  { %3014 = vst [vmem:[#allocation15_spill] sm:$0xff] %v2831_v29 }
 0x178   :  { %v1070_v33 = vpop.f32.mrf.mxu1  ;;  %v2833_v35 = vpop.f32.mrf.mxu0 }
 0x179   :  { %3015 = vst [vmem:[#allocation16_spill] sm:$0xff] %v2833_v35  ;;  %v296_v35 = vadd.f32 %v2747_v45, %v2729_v39 }
 0x17a   :  { %v2086_v34 = vpop.f32.mrf.mxu1  ;;  %v2105_v36 = vpop.f32.mrf.mxu0 }
 0x17b   :  { %v480_v22 = vadd.f32 %v2757_v15, %v296_v35  ;;  %v312_v35 = vadd.f32 %v2763_v3, %v2741_v32  ;;  %v307_v32 = vadd.f32 %v2775_v0, %v2753_v8 }
 0x17c   :  { %v1073_v10 = vpop.f32.mrf.mxu1  ;;  %v1301_v41 = vpop.f32.mrf.mxu0 }
 0x17e   :  { %v2835_v9 = vpop.f32.mrf.mxu1  ;;  %v2106_v14 = vpop.f32.mrf.mxu0 }
 0x180   :  { %v2837_v25 = vpop.f32.mrf.mxu1  ;;  %v2839_v24 = vpop.f32.mrf.mxu0 }
 0x181   :  { %3016 = vst [vmem:[#allocation17_spill] sm:$0xff] %v2837_v25  ;;  %v288_v25 = vadd.f32 %v2751_v47, %v2733_v42 }
 0x182   :  { %v2841_v28 = vpop.f32.mrf.mxu1  ;;  %v2843_v50 = vpop.f32.mrf.mxu0 }
 0x183   :  { %3017 = vst [vmem:[#allocation18_spill] sm:$0xff] %v2841_v28  ;;  %3018 = vst [vmem:[#allocation19_spill] sm:$0xff] %v2843_v50  ;;  %v807_v50 = vadd.f32 %v2045_v63, %v480_v22 }
 0x184   :  { %v2845_v23 = vpop.f32.mrf.mxu1  ;;  %v2847_v29 = vpop.f32.mrf.mxu0 }
 0x185   :  { %3019 = vst [vmem:[#allocation20_spill] sm:$0xff] %v2845_v23  ;;  %3020 = vst [vmem:[#allocation21_spill] sm:$0xff] %v2847_v29  ;;  %v299_v23 = vadd.f32 %v2755_v48, %v2735_v7  ;;  %v478_v29 = vadd.f32 %v2761_v55, %v288_v25  ;;  %v963_v15 = vadd.f32 %v2065_v26, %v807_v50 }
 0x186   :  { %v2851_v43 = vpop.f32.mrf.mxu1  ;;  %v2853_v30 = vpop.f32.mrf.mxu0  ;;  %v304_v7 = vadd.f32 %v2767_v31, %v2745_v6 }
 0x187   :  { %3021 = vst [vmem:[#allocation22_spill] sm:$0xff] %v2851_v43  ;;  %v291_v43 = vadd.f32 %v2759_v49, %v2739_v53  ;;  %v481_v42 = vadd.f32 %v2765_v4, %v299_v23  ;;  %v805_v47 = vadd.f32 %v758_v52, %v478_v29  ;;  %v315_v53 = vadd.f32 %v2771_v57, %v2749_v46 }
 0x188   :  { %v2858_v20 = vpop.f32.mrf.mxu1  ;;  %v2860_v28 = vpop.f32.mrf.mxu0  ;;  %v484_v49 = vadd.f32 %v2773_v58, %v312_v35  ;;  %v482_v3 = vadd.f32 %v2777_v5, %v304_v7  ;;  %v320_v57 = vadd.f32 %v2783_v1, %v2731_v40  ;;  %v2907_v1 = vld [vmem:[%s2995_s2] ss:$0 sm:$0xff] }
 0x189   :  { %v479_v63 = vadd.f32 %v2769_v56, %v291_v43  ;;  %v808_v22 = vadd.f32 %v2046_v18, %v481_v42  ;;  %v961_v25 = vadd.f32 %v914_v12, %v805_v47  ;;  %v328_v18 = vadd.f32 %v2779_v16, %v2727_v37 }
 0x18a   :  { %v2865_v39 = vpop.f32.mrf.mxu1  ;;  %v2867_v45 = vpop.f32.mrf.mxu0  ;;  %v485_v46 = vadd.f32 %v2781_v59, %v315_v53  ;;  %v811_v8 = vadd.f32 %v2801_v13, %v484_v49  ;;  %v331_v37 = vadd.f32 %v2787_v60, %v2737_v2  ;;  %v809_v16 = vadd.f32 %v2803_v21, %v482_v3  ;;  %v3029_v53 = vld [vmem:[#allocation7_spill] sm:$0xff] }
 0x18b   :  { %3022 = vst [vmem:[#allocation23_spill] sm:$0xff] %v2865_v39  ;;  %v1119_v39 = vadd.f32 %v2085_v27, %v963_v15  ;;  %v806_v31 = vadd.f32 %v2799_v11, %v479_v63  ;;  %v964_v52 = vadd.f32 %v2066_v17, %v808_v22  ;;  %v1117_v56 = vadd.f32 %v1070_v33, %v961_v25  ;;  %v3028_v25 = vld [vmem:[#allocation3_spill] sm:$0xff] }
 0x18c   :  { %v2876_v48 = vpop.f32.mrf.mxu1  ;;  %v2878_v55 = vpop.f32.mrf.mxu0  ;;  %v483_v17 = vadd.f32 %v2785_v54, %v307_v32  ;;  %v967_v59 = vadd.f32 %v2809_v51, %v811_v8  ;;  %v488_v54 = vadd.f32 %v2789_v62, %v328_v18  ;;  %v812_v27 = vadd.f32 %v2807_v19, %v485_v46  ;;  %v3025_v62 = vld [vmem:[#allocation8_spill] sm:$0xff]  ;;  %v3026_v19 = vld [vmem:[#allocation17_spill] sm:$0xff]  ;;  %v3030_v32 = vld [vmem:[#allocation10_spill] sm:$0xff] }
 0x18d   :  { %v1350_v43 = vadd.f32 %v2105_v36, %v1119_v39  ;;  %v962_v5 = vadd.f32 %v2805_v38, %v806_v31  ;;  %v1120_v26 = vadd.f32 %v2086_v34, %v964_v52  ;;  %v1348_v11 = vadd.f32 %v1301_v41, %v1117_v56  ;;  %v3024_v39 = vld [vmem:[#allocation6_spill] sm:$0xff] }
 0x18e   :  { %v2125_v6 = vpop.f32.mrf.mxu1  ;;  %v2887_v4 = vpop.f32.mrf.mxu0  ;;  %v965_v2 = vadd.f32 %v2813_v61, %v809_v16  ;;  %v1123_v60 = vadd.f32 %v2835_v9, %v967_v59  ;;  %v810_v42 = vadd.f32 %v3024_v39, %v483_v17  ;;  %v968_v47 = vadd.f32 %v3025_v62, %v812_v27  ;;  %v3027_v9 = vld [vmem:[#allocation19_spill] sm:$0xff]  ;;  %v3036_v16 = vld [vmem:[#allocation20_spill] sm:$0xff] }
 0x18f   :  { %v1506_v12 = vadd.f32 %v2125_v6, %v1350_v43  ;;  %v1118_v38 = vadd.f32 %v1073_v10, %v962_v5  ;;  %v1351_v23 = vadd.f32 %v2106_v14, %v1120_v26  ;;  %v3023_v10 = vld [vmem:[#allocation2_spill] sm:$0xff]  ;;  %v815_v49 = vadd.f32 %v3029_v53, %v488_v54  ;;  %v3032_v43 = vld [vmem:[#allocation21_spill] sm:$0xff]  ;;  %v3033_v5 = vld [vmem:[#allocation4_spill] sm:$0xff] }
 0x190   :  { %v1457_v58 = vpop.f32.mrf.mxu1  ;;  %v2896_v0 = vpop.f32.mrf.mxu0  ;;  %v323_v14 = vadd.f32 %v3023_v10, %v2743_v44  ;;  %v1121_v15 = vadd.f32 %v3026_v19, %v965_v2  ;;  %v1354_v7 = vadd.f32 %v3027_v9, %v1123_v60  ;;  %v486_v44 = vadd.f32 %v3028_v25, %v320_v57  ;;  %v3031_v6 = vld [vmem:[#allocation18_spill] sm:$0xff]  ;;  %v3034_v26 = vld [vmem:[#allocation9_spill] sm:$0xff]  ;;  %v3038_v27 = vld [vmem:[#allocation11_spill] sm:$0xff] }
 0x191   :  { %v1504_v41 = vadd.f32 %v1457_v58, %v1348_v11  ;;  %v1349_v29 = vadd.f32 %v2839_v24, %v1118_v38  ;;  %v966_v3 = vadd.f32 %v3030_v32, %v810_v42  ;;  %v1124_v31 = vadd.f32 %v3031_v6, %v968_v47  ;;  %v3037_v54 = vld [vmem:[#allocation5_spill] sm:$0xff]  ;;  %v3039_v60 = vld [vmem:[#allocation14_spill] sm:$0xff]  ;;  %v3042_v62 = vld [vmem:[#allocation15_spill] sm:$0xff] }
 0x192   :  { %v2126_v40 = vpop.f32.mrf.mxu1  ;;  %v2145_v13 = vpop.f32.mrf.mxu0  ;;  %v1352_v18 = vadd.f32 %v3032_v43, %v1121_v15  ;;  %v489_v57 = vadd.f32 %v3033_v5, %v331_v37  ;;  %v813_v11 = vadd.f32 %v3034_v26, %v486_v44  ;;  %v487_v37 = vadd.f32 %v3037_v54, %v323_v14  ;;  %v3041_v42 = vld [vmem:[#allocation13_spill] sm:$0xff] }
 0x193   :  { %v1662_v50 = vadd.f32 %v2145_v13, %v1506_v12  ;;  %v1507_v33 = vadd.f32 %v2126_v40, %v1351_v23  ;;  %v3035_v12 = vld [vmem:[#allocation12_spill] sm:$0xff]  ;;  %v1122_v59 = vadd.f32 %v3036_v16, %v966_v3  ;;  %v1355_v38 = vadd.f32 %v2853_v30, %v1124_v31 }
 0x194   :  { %v1460_v21 = vpop.f32.mrf.mxu1  ;;  %v1613_v51 = vpop.f32.mrf.mxu0  ;;  %v971_v17 = vadd.f32 %v3035_v12, %v815_v49  ;;  %v816_v2 = vadd.f32 %v3038_v27, %v489_v57  ;;  %v814_v14 = vadd.f32 %v3041_v42, %v487_v37 }
 0x195   :  { %v1680_v34 = vadd.f32 %v2907_v1, %v1662_v50  ;;  %v1660_v36 = vadd.f32 %v1613_v51, %v1504_v41  ;;  %v1505_v24 = vadd.f32 %v1460_v21, %v1349_v29  ;;  %v969_v21 = vadd.f32 %v3039_v60, %v813_v11  ;;  %v3040_v51 = vld [vmem:[#allocation22_spill] sm:$0xff] }
 0x196   :  { %v2129_v61 = vpop.f32.mrf.mxu1  ;;  %v2146_v35 = vpop.f32.mrf.mxu0  ;;  %v1127_v29 = vadd.f32 %v3040_v51, %v971_v17  ;;  %v1353_v30 = vadd.f32 %v2860_v28, %v1122_v59  ;;  %v972_v47 = vadd.f32 %v3042_v62, %v816_v2 }
 0x197   :  { %1692 = vst [vmem:[%s2996_s3 + $0x10] sm:$0xff] %v1680_v34  ;;  %v1678_v63 = vadd.f32 %v2907_v1, %v1660_v36  ;;  %v1663_v22 = vadd.f32 %v2146_v35, %v1507_v33  ;;  %v1510_v46 = vadd.f32 %v2129_v61, %v1354_v7  ;;  %v1125_v19 = vadd.f32 %v2858_v20, %v969_v21 }
 0x198   :  { %v1473_v52 = vpop.f32.mrf.mxu1  ;;  %v1616_v56 = vpop.f32.mrf.mxu0  ;;  %v1358_v35 = vadd.f32 %v2867_v45, %v1127_v29 }
 0x199   :  { %1690 = vst [vmem:[%s2996_s3] sm:$0xff] %v1678_v63  ;;  %v1681_v8 = vadd.f32 %v2907_v1, %v1663_v22  ;;  %v1661_v58 = vadd.f32 %v1616_v56, %v1505_v24  ;;  %v1508_v23 = vadd.f32 %v1473_v52, %v1352_v18  ;;  %v3043_v24 = vld [vmem:[#allocation16_spill] sm:$0xff]  ;;  %v3044_v22 = vld [vmem:[#allocation23_spill] sm:$0xff]  ;;  %v1356_v20 = vadd.f32 %v2878_v55, %v1125_v19 }
 0x19a   :  { %v2130_v40 = vpop.f32.mrf.mxu1  ;;  %v2149_v13 = vpop.f32.mrf.mxu0  ;;  %v970_v63 = vadd.f32 %v3043_v24, %v814_v14  ;;  %v1128_v25 = vadd.f32 %v3044_v22, %v972_v47 }
 0x19b   :  { %1693 = vst [vmem:[%s2996_s3 + $0x18] sm:$0xff] %v1681_v8  ;;  %v1679_v41 = vadd.f32 %v2907_v1, %v1661_v58  ;;  %v1666_v50 = vadd.f32 %v2149_v13, %v1510_v46  ;;  %v1511_v36 = vadd.f32 %v2130_v40, %v1355_v38 }
 0x19c   :  { %v1476_v33 = vpop.f32.mrf.mxu1  ;;  %v1629_v34 = vpop.f32.mrf.mxu0  ;;  %v1126_v3 = vadd.f32 %v2876_v48, %v970_v63  ;;  %v1359_v52 = vadd.f32 %v2887_v4, %v1128_v25 }
 0x19d   :  { %1691 = vst [vmem:[%s2996_s3 + $0x8] sm:$0xff] %v1679_v41  ;;  %v1684_v10 = vadd.f32 %v2907_v1, %v1666_v50  ;;  %v1664_v39 = vadd.f32 %v1629_v34, %v1508_v23  ;;  %v1509_v28 = vadd.f32 %v1476_v33, %v1353_v30 }
 0x19e   :  { %v2133_v15 = vpop.f32.mrf.mxu1  ;;  %v2150_v61 = vpop.f32.mrf.mxu0  ;;  %v1357_v8 = vadd.f32 %v2896_v0, %v1126_v3 }
 0x19f   :  { %1696 = vst [vmem:[%s2996_s3 + $0x30] sm:$0xff] %v1684_v10  ;;  %v1682_v9 = vadd.f32 %v2907_v1, %v1664_v39  ;;  %v1667_v7 = vadd.f32 %v2150_v61, %v1511_v36  ;;  %v1514_v45 = vadd.f32 %v2133_v15, %v1358_v35 }
 0x1a0   :  { %v1489_v44 = vpop.f32.mrf.mxu1  ;;  %v1632_v53 = vpop.f32.mrf.mxu0 }
 0x1a1   :  { %1694 = vst [vmem:[%s2996_s3 + $0x20] sm:$0xff] %v1682_v9  ;;  %v1685_v49 = vadd.f32 %v2907_v1, %v1667_v7  ;;  %v1665_v32 = vadd.f32 %v1632_v53, %v1509_v28  ;;  %v1512_v56 = vadd.f32 %v1489_v44, %v1356_v20 }
 0x1a2   :  { %v2134_v6 = vpop.f32.mrf.mxu1  ;;  %v2153_v31 = vpop.f32.mrf.mxu0 }
 0x1a3   :  { %1697 = vst [vmem:[%s2996_s3 + $0x38] sm:$0xff] %v1685_v49  ;;  %v1683_v55 = vadd.f32 %v2907_v1, %v1665_v32  ;;  %v1670_v43 = vadd.f32 %v2153_v31, %v1514_v45  ;;  %v1515_v48 = vadd.f32 %v2134_v6, %v1359_v52 }
 0x1a4   :  { %v1492_v18 = vpop.f32.mrf.mxu1  ;;  %v1645_v46 = vpop.f32.mrf.mxu0 }
 0x1a5   :  { %1695 = vst [vmem:[%s2996_s3 + $0x28] sm:$0xff] %v1683_v55  ;;  %v1688_v58 = vadd.f32 %v2907_v1, %v1670_v43  ;;  %v1668_v4 = vadd.f32 %v1645_v46, %v1512_v56  ;;  %v1513_v57 = vadd.f32 %v1492_v18, %v1357_v8 }
 0x1a6   :  { %v2154_v5 = vpop.f32.mrf.mxu0 }
 0x1a7   :  { %1700 = vst [vmem:[%s2996_s3 + $0x50] sm:$0xff] %v1688_v58  ;;  %v1686_v26 = vadd.f32 %v2907_v1, %v1668_v4  ;;  %v1671_v11 = vadd.f32 %v2154_v5, %v1515_v48 }
 0x1a8   :  { %v1648_v12 = vpop.f32.mrf.mxu0 }
 0x1a9   :  { %1698 = vst [vmem:[%s2996_s3 + $0x40] sm:$0xff] %v1686_v26  ;;  %v1689_v0 = vadd.f32 %v2907_v1, %v1671_v11  ;;  %v1669_v17 = vadd.f32 %v1648_v12, %v1513_v57 }
 0x1ab   :  { %1701 = vst [vmem:[%s2996_s3 + $0x58] sm:$0xff] %v1689_v0  ;;  %v1687_v16 = vadd.f32 %v2907_v1, %v1669_v17 }
 0x1ad   :  { %1699 = vst [vmem:[%s2996_s3 + $0x48] sm:$0xff] %v1687_v16 }

</bundles_post_ra>
